<compile_context>
chip_gen: v7x
topology: tpu7x:2x2x1
jax: 0.10.0
libtpu: 0.0.40
codegen_flags: <defaults>
</compile_context>

<pallas_src>
import numpy as np
import jax
import jax.numpy as jnp
from jax import lax
from jax.experimental import pallas as pl
from jax.experimental.pallas import tpu as pltpu

GROUPS = 32       # normalization(channels) == nn.GroupNorm(32, channels)
G_PAD = 128       # group axis padded to a full lane tile
EPS = 1e-5
LANE = 128
SUBLANE = 8


def _round_up(n, m):
    return ((n + m - 1) // m) * m


# ----------------------------------------------------------------------------
# In-kernel helpers
# ----------------------------------------------------------------------------
def _silu(x):
    # exp already sits in the EUP slot; exact form kept for the rtol=1e-3 check.
    return x * (1.0 / (1.0 + jnp.exp(-x)))


def _group_norm(x, m, mt, gamma, beta):
    """GroupNorm(32, C) on an [N, Cp] tile via one-hot group-projection matmuls.

    `m`  (Cp, Gp) = one-hot / cpg : [x ; x*x] @ m  -> [mean ; E[x^2]]   (1 dot)
    `mt` (Gp, Cp) = one-hot^T     : [mean ; var] @ mt -> per-channel     (1 dot)
    Padded channels / groups are zero rows/cols, so they contribute nothing.
    """
    n = x.shape[0]
    stacked = jnp.concatenate([x, x * x], axis=0)                       # (2N, Cp)
    stats = jnp.dot(stacked, m, preferred_element_type=jnp.float32)     # (2N, Gp)
    mean = stats[:n]
    var = jnp.maximum(stats[n:] - mean * mean, 0.0)                     # one-pass var, clamped
    mv = jnp.concatenate([mean, var], axis=0)                           # (2N, Gp)
    mv_c = jnp.dot(mv, mt, preferred_element_type=jnp.float32)          # (2N, Cp)
    xhat = (x - mv_c[:n]) * lax.rsqrt(mv_c[n:] + EPS)
    return xhat * gamma + beta


def _resblock_body(x, emb, m1, m1t, g1, b1, w_in, w_emb, b_ie,
                   m2, m2t, g2, b2, w_out, b_fin):
    # in_layers: GroupNorm -> SiLU -> Linear(C,O)   |   emb_layers: SiLU -> Linear(E,O)
    a_in = _silu(_group_norm(x, m1, m1t, g1, b1))
    h = (jnp.dot(a_in, w_in, preferred_element_type=jnp.float32)
         + jnp.dot(_silu(emb), w_emb, preferred_element_type=jnp.float32)
         + b_ie)                                                          # (N, Op)
    # out_layers: GroupNorm -> SiLU -> Dropout -> zero_module(Linear(O,O))
    # TODO(synk): nn.Dropout(p=dropout) sits here; p=0 / eval mode => identity.
    a2 = _silu(_group_norm(h, m2, m2t, g2, b2))
    return jnp.dot(a2, w_out, preferred_element_type=jnp.float32) + b_fin


def resblock_kernel_identity(x_ref, emb_ref, m1_ref, m1t_ref, g1_ref, b1_ref,
                             w_in_ref, w_emb_ref, b_ie_ref,
                             m2_ref, m2t_ref, g2_ref, b2_ref,
                             w_out_ref, b_fin_ref, o_ref):
    x = x_ref[...]
    h = _resblock_body(x, emb_ref[...], m1_ref[...], m1t_ref[...],
                       g1_ref[...], b1_ref[...], w_in_ref[...], w_emb_ref[...],
                       b_ie_ref[...], m2_ref[...], m2t_ref[...], g2_ref[...],
                       b2_ref[...], w_out_ref[...], b_fin_ref[...])
    o_ref[...] = x + h                       # skip_connection = nn.Identity()


def resblock_kernel_skip(x_ref, emb_ref, m1_ref, m1t_ref, g1_ref, b1_ref,
                         w_in_ref, w_emb_ref, b_ie_ref,
                         m2_ref, m2t_ref, g2_ref, b2_ref,
                         w_out_ref, b_fin_ref, w_skip_ref, o_ref):
    x = x_ref[...]
    h = _resblock_body(x, emb_ref[...], m1_ref[...], m1t_ref[...],
                       g1_ref[...], b1_ref[...], w_in_ref[...], w_emb_ref[...],
                       b_ie_ref[...], m2_ref[...], m2t_ref[...], g2_ref[...],
                       b2_ref[...], w_out_ref[...], b_fin_ref[...])
    # skip_connection = nn.Linear(C, O); its bias is folded into b_fin host-side.
    o_ref[...] = jnp.dot(x, w_skip_ref[...], preferred_element_type=jnp.float32) + h


# ----------------------------------------------------------------------------
# pallas_call wrapper
# ----------------------------------------------------------------------------
def resblock_forward(params, x, emb, block_rows=256):
    n = x.shape[0]
    c, e, o = params["channels"], params["emb_channels"], params["out_channels"]
    c_p, e_p, o_p = params["c_pad"], params["e_pad"], params["o_pad"]

    bn = min(_round_up(block_rows, SUBLANE), _round_up(n, SUBLANE))
    n_pad = _round_up(n, bn)

    x_pad = jnp.pad(x.astype(jnp.float32), ((0, n_pad - n), (0, c_p - c)))
    emb_pad = jnp.pad(emb.astype(jnp.float32), ((0, n_pad - n), (0, e_p - e)))

    weights = (params["m1"], params["m1t"], params["gn1_w"], params["gn1_b"],
               params["w_in"], params["w_emb"], params["b_in_emb"],
               params["m2"], params["m2t"], params["gn2_w"], params["gn2_b"],
               params["w_out"], params["b_final"])
    if params["skip_is_identity"]:
        kern = resblock_kernel_identity
        weights_all = weights
    else:
        kern = resblock_kernel_skip
        weights_all = weights + (params["w_skip"],)

    out_sd = jax.ShapeDtypeStruct((n_pad, o_p), jnp.float32)
    num_blocks = n_pad // bn

    if num_blocks == 1:
        # Single block: no grid, no pipeline bookkeeping — all operands in VMEM.
        out = pl.pallas_call(kern, out_shape=out_sd)(x_pad, emb_pad, *weights_all)
    else:
        # Row-tiled grid: activations stream per block; weights get a constant
        # block index (stay resident, no re-DMA); row axis split across cores.
        in_specs = ([pl.BlockSpec((bn, c_p), lambda i: (i, 0)),
                     pl.BlockSpec((bn, e_p), lambda i: (i, 0))]
                    + [pl.BlockSpec(w.shape, lambda i: (0, 0)) for w in weights_all])
        out = pl.pallas_call(
            kern,
            grid=(num_blocks,),
            in_specs=in_specs,
            out_specs=pl.BlockSpec((bn, o_p), lambda i: (i, 0)),
            out_shape=out_sd,
            compiler_params=pltpu.CompilerParams(
                dimension_semantics=("parallel",)),
        )(x_pad, emb_pad, *weights_all)

    return out[:n, :o]


# ----------------------------------------------------------------------------
# Parameter construction (mirrors the PyTorch __init__ shapes, zero-padded)
# ----------------------------------------------------------------------------
def _group_matrices(channels, c_pad):
    cpg = channels // GROUPS
    ch = np.arange(channels)
    onehot = (ch[:, None] // cpg == np.arange(GROUPS)[None, :]).astype(np.float32)  # (C, 32)
    m = np.zeros((c_pad, G_PAD), np.float32)
    m[:channels, :GROUPS] = onehot / float(cpg)       # forward: yields mean / E[x^2] directly
    mt = np.zeros((G_PAD, c_pad), np.float32)
    mt[:GROUPS, :channels] = onehot.T                 # backward: broadcast group stat to channels
    return jnp.asarray(m), jnp.asarray(mt)


def _linear_params(key, fan_in, fan_out, in_pad, out_pad, scale=1.0):
    # PyTorch nn.Linear default init; stored transposed (in, out), zero-padded.
    kw, kb = jax.random.split(key)
    bound = 1.0 / np.sqrt(fan_in)
    w = jax.random.uniform(kw, (fan_in, fan_out), jnp.float32, -bound, bound) * scale
    b = jax.random.uniform(kb, (fan_out,), jnp.float32, -bound, bound) * scale
    w_pad = jnp.zeros((in_pad, out_pad), jnp.float32).at[:fan_in, :fan_out].set(w)
    b_pad = jnp.zeros((1, out_pad), jnp.float32).at[0, :fan_out].set(b)
    return w, b, w_pad, b_pad


def init_resblock(key, channels, emb_channels, out_channels=None):
    out_channels = out_channels or channels
    c_pad = _round_up(channels, LANE)
    e_pad = _round_up(emb_channels, LANE)
    o_pad = _round_up(out_channels, LANE)
    k1, k2, k3, k4 = jax.random.split(key, 4)

    m1, m1t = _group_matrices(channels, c_pad)
    m2, m2t = _group_matrices(out_channels, o_pad)

    w_in, b_in, w_in_p, b_in_p = _linear_params(k1, channels, out_channels, c_pad, o_pad)
    w_emb, b_emb, w_emb_p, b_emb_p = _linear_params(k2, emb_channels, out_channels, e_pad, o_pad)
    # NOTE: zero_module(linear(...)) is zero-initialized in the reference __init__;
    # small random weights are used so the full datapath is numerically exercised.
    w_out, b_out, w_out_p, b_out_p = _linear_params(k3, out_channels, out_channels,
                                                    o_pad, o_pad, scale=1e-2)

    skip_is_identity = (out_channels == channels)
    if skip_is_identity:
        w_skip = b_skip = w_skip_p = None
        b_final = b_out_p
    else:
        w_skip, b_skip, w_skip_p, b_skip_p = _linear_params(k4, channels, out_channels,
                                                            c_pad, o_pad)
        b_final = b_out_p + b_skip_p          # skip bias folded into the final bias

    return dict(
        channels=channels, emb_channels=emb_channels, out_channels=out_channels,
        c_pad=c_pad, e_pad=e_pad, o_pad=o_pad,
        skip_is_identity=skip_is_identity,
        # kernel-facing (padded) params
        m1=m1, m1t=m1t, m2=m2, m2t=m2t,
        gn1_w=jnp.zeros((1, c_pad), jnp.float32).at[0, :channels].set(1.0),
        gn1_b=jnp.zeros((1, c_pad), jnp.float32),
        gn2_w=jnp.zeros((1, o_pad), jnp.float32).at[0, :out_channels].set(1.0),
        gn2_b=jnp.zeros((1, o_pad), jnp.float32),
        w_in=w_in_p, w_emb=w_emb_p, b_in_emb=b_in_p + b_emb_p,
        w_out=w_out_p, b_final=b_final, w_skip=w_skip_p,
        # raw (unpadded) params for the pure-JAX reference
        w_in_raw=w_in, b_in_raw=b_in, w_emb_raw=w_emb, b_emb_raw=b_emb,
        w_out_raw=w_out, b_out_raw=b_out, w_skip_raw=w_skip, b_skip_raw=b_skip,
    )


# ----------------------------------------------------------------------------
# Pure-JAX reference (mirrors the PyTorch ResBlock._forward exactly)
# ----------------------------------------------------------------------------
def _ref_silu(x):
    return x * (1.0 / (1.0 + jnp.exp(-x)))


def _ref_gn(x):
    n, c = x.shape
    xg = x.reshape(n, GROUPS, c // GROUPS)
    mean = xg.mean(-1, keepdims=True)
    var = ((xg - mean) ** 2).mean(-1, keepdims=True)
    return ((xg - mean) / jnp.sqrt(var + EPS)).reshape(n, c)   # gamma=1, beta=0


def reference_forward(p, x, emb):
    h = _ref_silu(_ref_gn(x)) @ p["w_in_raw"] + p["b_in_raw"]
    emb_out = _ref_silu(emb) @ p["w_emb_raw"] + p["b_emb_raw"]
    h = h + emb_out
    h = _ref_silu(_ref_gn(h)) @ p["w_out_raw"] + p["b_out_raw"]
    if p["skip_is_identity"]:
        return x + h
    return (x @ p["w_skip_raw"] + p["b_skip_raw"]) + h


# ----------------------------------------------------------------------------
if __name__ == "__main__":
    key = jax.random.PRNGKey(0)
    kx, ke, kx2, ke2, kp1, kp2 = jax.random.split(key, 6)

    C, E = 64, 128       # channels, emb_channels

    # Case 1: small batch, out_channels == channels -> Identity skip (no-grid path).
    N = 8
    x = jax.random.normal(kx, (N, C), jnp.float32)
    emb = jax.random.normal(ke, (N, E), jnp.float32)
    p1 = init_resblock(kp1, C, E)
    out1 = jax.block_until_ready(resblock_forward(p1, x, emb))
    ref1 = reference_forward(p1, x, emb)
    np.testing.assert_allclose(np.asarray(out1), np.asarray(ref1), rtol=1e-3, atol=1e-4)
    assert out1.shape == (N, C) and out1.dtype == jnp.float32

    # Case 2: out_channels != channels -> skip_connection = nn.Linear(C, O) (no-grid path).
    O = 128
    p2 = init_resblock(kp2, C, E, out_channels=O)
    out2 = jax.block_until_ready(resblock_forward(p2, x, emb))
    ref2 = reference_forward(p2, x, emb)
    np.testing.assert_allclose(np.asarray(out2), np.asarray(ref2), rtol=1e-3, atol=1e-4)
    assert out2.shape == (N, O) and out2.dtype == jnp.float32

    # Case 3: larger batch -> row-tiled "parallel" grid, resident weights.
    N2 = 256
    x2 = jax.random.normal(kx2, (N2, C), jnp.float32)
    emb2 = jax.random.normal(ke2, (N2, E), jnp.float32)
    out3 = jax.block_until_ready(resblock_forward(p1, x2, emb2, block_rows=64))
    ref3 = reference_forward(p1, x2, emb2)
    np.testing.assert_allclose(np.asarray(out3), np.asarray(ref3), rtol=1e-3, atol=1e-4)
    out4 = jax.block_until_ready(resblock_forward(p2, x2, emb2, block_rows=64))
    ref4 = reference_forward(p2, x2, emb2)
    np.testing.assert_allclose(np.asarray(out4), np.asarray(ref4), rtol=1e-3, atol=1e-4)

    print("KERNEL_OK")
</pallas_src>

<mosaic_0001>
module attributes {stable_mosaic.version = 11 : i64} {
  func.func @resblock_kernel_identity(%arg0: memref<8x128xf32, #tpu.memory_space<vmem>>, %arg1: memref<8x128xf32, #tpu.memory_space<vmem>>, %arg2: memref<128x128xf32, #tpu.memory_space<vmem>>, %arg3: memref<128x128xf32, #tpu.memory_space<vmem>>, %arg4: memref<1x128xf32, #tpu.memory_space<vmem>>, %arg5: memref<1x128xf32, #tpu.memory_space<vmem>>, %arg6: memref<128x128xf32, #tpu.memory_space<vmem>>, %arg7: memref<128x128xf32, #tpu.memory_space<vmem>>, %arg8: memref<1x128xf32, #tpu.memory_space<vmem>>, %arg9: memref<128x128xf32, #tpu.memory_space<vmem>>, %arg10: memref<128x128xf32, #tpu.memory_space<vmem>>, %arg11: memref<1x128xf32, #tpu.memory_space<vmem>>, %arg12: memref<1x128xf32, #tpu.memory_space<vmem>>, %arg13: memref<128x128xf32, #tpu.memory_space<vmem>>, %arg14: memref<1x128xf32, #tpu.memory_space<vmem>>, %arg15: memref<8x128xf32, #tpu.memory_space<vmem>>) attributes {dimension_semantics = [], scalar_prefetch = 0 : i64, scratch_operands = 0 : i64, tpu.core_type = #tpu.core_type<tc>} {
    %c0 = arith.constant 0 : index
    %c0_0 = arith.constant 0 : index
    %0 = vector.load %arg0[%c0, %c0_0] : memref<8x128xf32, #tpu.memory_space<vmem>>, vector<8x128xf32>
    %c0_1 = arith.constant 0 : index
    %c0_2 = arith.constant 0 : index
    %1 = vector.load %arg1[%c0_1, %c0_2] : memref<8x128xf32, #tpu.memory_space<vmem>>, vector<8x128xf32>
    %c0_3 = arith.constant 0 : index
    %c0_4 = arith.constant 0 : index
    %2 = vector.load %arg2[%c0_3, %c0_4] : memref<128x128xf32, #tpu.memory_space<vmem>>, vector<128x128xf32>
    %c0_5 = arith.constant 0 : index
    %c0_6 = arith.constant 0 : index
    %3 = vector.load %arg3[%c0_5, %c0_6] : memref<128x128xf32, #tpu.memory_space<vmem>>, vector<128x128xf32>
    %c0_7 = arith.constant 0 : index
    %c0_8 = arith.constant 0 : index
    %4 = vector.load %arg4[%c0_7, %c0_8] : memref<1x128xf32, #tpu.memory_space<vmem>>, vector<1x128xf32>
    %c0_9 = arith.constant 0 : index
    %c0_10 = arith.constant 0 : index
    %5 = vector.load %arg5[%c0_9, %c0_10] : memref<1x128xf32, #tpu.memory_space<vmem>>, vector<1x128xf32>
    %c0_11 = arith.constant 0 : index
    %c0_12 = arith.constant 0 : index
    %6 = vector.load %arg6[%c0_11, %c0_12] : memref<128x128xf32, #tpu.memory_space<vmem>>, vector<128x128xf32>
    %c0_13 = arith.constant 0 : index
    %c0_14 = arith.constant 0 : index
    %7 = vector.load %arg7[%c0_13, %c0_14] : memref<128x128xf32, #tpu.memory_space<vmem>>, vector<128x128xf32>
    %c0_15 = arith.constant 0 : index
    %c0_16 = arith.constant 0 : index
    %8 = vector.load %arg8[%c0_15, %c0_16] : memref<1x128xf32, #tpu.memory_space<vmem>>, vector<1x128xf32>
    %c0_17 = arith.constant 0 : index
    %c0_18 = arith.constant 0 : index
    %9 = vector.load %arg9[%c0_17, %c0_18] : memref<128x128xf32, #tpu.memory_space<vmem>>, vector<128x128xf32>
    %c0_19 = arith.constant 0 : index
    %c0_20 = arith.constant 0 : index
    %10 = vector.load %arg10[%c0_19, %c0_20] : memref<128x128xf32, #tpu.memory_space<vmem>>, vector<128x128xf32>
    %c0_21 = arith.constant 0 : index
    %c0_22 = arith.constant 0 : index
    %11 = vector.load %arg11[%c0_21, %c0_22] : memref<1x128xf32, #tpu.memory_space<vmem>>, vector<1x128xf32>
    %c0_23 = arith.constant 0 : index
    %c0_24 = arith.constant 0 : index
    %12 = vector.load %arg12[%c0_23, %c0_24] : memref<1x128xf32, #tpu.memory_space<vmem>>, vector<1x128xf32>
    %c0_25 = arith.constant 0 : index
    %c0_26 = arith.constant 0 : index
    %13 = vector.load %arg13[%c0_25, %c0_26] : memref<128x128xf32, #tpu.memory_space<vmem>>, vector<128x128xf32>
    %c0_27 = arith.constant 0 : index
    %c0_28 = arith.constant 0 : index
    %14 = vector.load %arg14[%c0_27, %c0_28] : memref<1x128xf32, #tpu.memory_space<vmem>>, vector<1x128xf32>
    %15 = arith.mulf %0, %0 : vector<8x128xf32>
    %16 = tpu.concatenate %0, %15 in 0 : vector<8x128xf32>, vector<8x128xf32> -> vector<16x128xf32>
    %cst = arith.constant dense<0.000000e+00> : vector<16x128xf32>
    %17 = tpu.matmul %16, %2, %cst {dimension_numbers = #tpu.dot_dimension_numbers<[1], [0], [0], [1], [0, 0, 1, 1], [], []>} : vector<16x128xf32>, vector<128x128xf32>, vector<16x128xf32> -> vector<16x128xf32>
    %18 = vector.extract_strided_slice %17 {offsets = [0, 0], sizes = [8, 128], strides = [1, 1]} : vector<16x128xf32> to vector<8x128xf32>
    %19 = vector.extract_strided_slice %17 {offsets = [8, 0], sizes = [8, 128], strides = [1, 1]} : vector<16x128xf32> to vector<8x128xf32>
    %20 = arith.mulf %18, %18 : vector<8x128xf32>
    %21 = arith.subf %19, %20 : vector<8x128xf32>
    %cst_29 = arith.constant 0.000000e+00 : f32
    %22 = vector.broadcast %cst_29 : f32 to vector<8x128xf32>
    %23 = arith.maximumf %21, %22 : vector<8x128xf32>
    %24 = tpu.concatenate %18, %23 in 0 : vector<8x128xf32>, vector<8x128xf32> -> vector<16x128xf32>
    %cst_30 = arith.constant dense<0.000000e+00> : vector<16x128xf32>
    %25 = tpu.matmul %24, %3, %cst_30 {dimension_numbers = #tpu.dot_dimension_numbers<[1], [0], [0], [1], [0, 0, 1, 1], [], []>} : vector<16x128xf32>, vector<128x128xf32>, vector<16x128xf32> -> vector<16x128xf32>
    %26 = vector.extract_strided_slice %25 {offsets = [0, 0], sizes = [8, 128], strides = [1, 1]} : vector<16x128xf32> to vector<8x128xf32>
    %27 = arith.subf %0, %26 : vector<8x128xf32>
    %28 = vector.extract_strided_slice %25 {offsets = [8, 0], sizes = [8, 128], strides = [1, 1]} : vector<16x128xf32> to vector<8x128xf32>
    %cst_31 = arith.constant 9.99999974E-6 : f32
    %29 = vector.broadcast %cst_31 : f32 to vector<8x128xf32>
    %30 = arith.addf %28, %29 : vector<8x128xf32>
    %31 = math.rsqrt %30 : vector<8x128xf32>
    %32 = arith.mulf %27, %31 : vector<8x128xf32>
    %33 = vector.broadcast %4 : vector<1x128xf32> to vector<8x128xf32>
    %34 = arith.mulf %32, %33 : vector<8x128xf32>
    %35 = vector.broadcast %5 : vector<1x128xf32> to vector<8x128xf32>
    %36 = arith.addf %34, %35 : vector<8x128xf32>
    %cst_32 = arith.constant 0.000000e+00 : f32
    %37 = vector.broadcast %cst_32 : f32 to vector<8x128xf32>
    %38 = arith.subf %37, %36 : vector<8x128xf32>
    %39 = math.exp %38 : vector<8x128xf32>
    %cst_33 = arith.constant 1.000000e+00 : f32
    %40 = vector.broadcast %cst_33 : f32 to vector<8x128xf32>
    %41 = arith.addf %40, %39 : vector<8x128xf32>
    %cst_34 = arith.constant 1.000000e+00 : f32
    %42 = vector.broadcast %cst_34 : f32 to vector<8x128xf32>
    %43 = arith.divf %42, %41 : vector<8x128xf32>
    %44 = arith.mulf %36, %43 : vector<8x128xf32>
    %cst_35 = arith.constant dense<0.000000e+00> : vector<8x128xf32>
    %45 = tpu.matmul %44, %6, %cst_35 {dimension_numbers = #tpu.dot_dimension_numbers<[1], [0], [0], [1], [0, 0, 1, 1], [], []>} : vector<8x128xf32>, vector<128x128xf32>, vector<8x128xf32> -> vector<8x128xf32>
    %cst_36 = arith.constant 0.000000e+00 : f32
    %46 = vector.broadcast %cst_36 : f32 to vector<8x128xf32>
    %47 = arith.subf %46, %1 : vector<8x128xf32>
    %48 = math.exp %47 : vector<8x128xf32>
    %cst_37 = arith.constant 1.000000e+00 : f32
    %49 = vector.broadcast %cst_37 : f32 to vector<8x128xf32>
    %50 = arith.addf %49, %48 : vector<8x128xf32>
    %cst_38 = arith.constant 1.000000e+00 : f32
    %51 = vector.broadcast %cst_38 : f32 to vector<8x128xf32>
    %52 = arith.divf %51, %50 : vector<8x128xf32>
    %53 = arith.mulf %1, %52 : vector<8x128xf32>
    %cst_39 = arith.constant dense<0.000000e+00> : vector<8x128xf32>
    %54 = tpu.matmul %53, %7, %cst_39 {dimension_numbers = #tpu.dot_dimension_numbers<[1], [0], [0], [1], [0, 0, 1, 1], [], []>} : vector<8x128xf32>, vector<128x128xf32>, vector<8x128xf32> -> vector<8x128xf32>
    %55 = arith.addf %45, %54 : vector<8x128xf32>
    %56 = vector.broadcast %8 : vector<1x128xf32> to vector<8x128xf32>
    %57 = arith.addf %55, %56 : vector<8x128xf32>
    %58 = arith.mulf %57, %57 : vector<8x128xf32>
    %59 = tpu.concatenate %57, %58 in 0 : vector<8x128xf32>, vector<8x128xf32> -> vector<16x128xf32>
    %cst_40 = arith.constant dense<0.000000e+00> : vector<16x128xf32>
    %60 = tpu.matmul %59, %9, %cst_40 {dimension_numbers = #tpu.dot_dimension_numbers<[1], [0], [0], [1], [0, 0, 1, 1], [], []>} : vector<16x128xf32>, vector<128x128xf32>, vector<16x128xf32> -> vector<16x128xf32>
    %61 = vector.extract_strided_slice %60 {offsets = [0, 0], sizes = [8, 128], strides = [1, 1]} : vector<16x128xf32> to vector<8x128xf32>
    %62 = vector.extract_strided_slice %60 {offsets = [8, 0], sizes = [8, 128], strides = [1, 1]} : vector<16x128xf32> to vector<8x128xf32>
    %63 = arith.mulf %61, %61 : vector<8x128xf32>
    %64 = arith.subf %62, %63 : vector<8x128xf32>
    %cst_41 = arith.constant 0.000000e+00 : f32
    %65 = vector.broadcast %cst_41 : f32 to vector<8x128xf32>
    %66 = arith.maximumf %64, %65 : vector<8x128xf32>
    %67 = tpu.concatenate %61, %66 in 0 : vector<8x128xf32>, vector<8x128xf32> -> vector<16x128xf32>
    %cst_42 = arith.constant dense<0.000000e+00> : vector<16x128xf32>
    %68 = tpu.matmul %67, %10, %cst_42 {dimension_numbers = #tpu.dot_dimension_numbers<[1], [0], [0], [1], [0, 0, 1, 1], [], []>} : vector<16x128xf32>, vector<128x128xf32>, vector<16x128xf32> -> vector<16x128xf32>
    %69 = vector.extract_strided_slice %68 {offsets = [0, 0], sizes = [8, 128], strides = [1, 1]} : vector<16x128xf32> to vector<8x128xf32>
    %70 = arith.subf %57, %69 : vector<8x128xf32>
    %71 = vector.extract_strided_slice %68 {offsets = [8, 0], sizes = [8, 128], strides = [1, 1]} : vector<16x128xf32> to vector<8x128xf32>
    %cst_43 = arith.constant 9.99999974E-6 : f32
    %72 = vector.broadcast %cst_43 : f32 to vector<8x128xf32>
    %73 = arith.addf %71, %72 : vector<8x128xf32>
    %74 = math.rsqrt %73 : vector<8x128xf32>
    %75 = arith.mulf %70, %74 : vector<8x128xf32>
    %76 = vector.broadcast %11 : vector<1x128xf32> to vector<8x128xf32>
    %77 = arith.mulf %75, %76 : vector<8x128xf32>
    %78 = vector.broadcast %12 : vector<1x128xf32> to vector<8x128xf32>
    %79 = arith.addf %77, %78 : vector<8x128xf32>
    %cst_44 = arith.constant 0.000000e+00 : f32
    %80 = vector.broadcast %cst_44 : f32 to vector<8x128xf32>
    %81 = arith.subf %80, %79 : vector<8x128xf32>
    %82 = math.exp %81 : vector<8x128xf32>
    %cst_45 = arith.constant 1.000000e+00 : f32
    %83 = vector.broadcast %cst_45 : f32 to vector<8x128xf32>
    %84 = arith.addf %83, %82 : vector<8x128xf32>
    %cst_46 = arith.constant 1.000000e+00 : f32
    %85 = vector.broadcast %cst_46 : f32 to vector<8x128xf32>
    %86 = arith.divf %85, %84 : vector<8x128xf32>
    %87 = arith.mulf %79, %86 : vector<8x128xf32>
    %cst_47 = arith.constant dense<0.000000e+00> : vector<8x128xf32>
    %88 = tpu.matmul %87, %13, %cst_47 {dimension_numbers = #tpu.dot_dimension_numbers<[1], [0], [0], [1], [0, 0, 1, 1], [], []>} : vector<8x128xf32>, vector<128x128xf32>, vector<8x128xf32> -> vector<8x128xf32>
    %89 = vector.broadcast %14 : vector<1x128xf32> to vector<8x128xf32>
    %90 = arith.addf %88, %89 : vector<8x128xf32>
    %91 = arith.addf %0, %90 : vector<8x128xf32>
    %c0_48 = arith.constant 0 : index
    %c0_49 = arith.constant 0 : index
    %92 = vector.load %arg15[%c0_48, %c0_49] : memref<8x128xf32, #tpu.memory_space<vmem>>, vector<8x128xf32>
    tpu.vector_store %arg15[%c0_48, %c0_49], %91 {strides = array<i32>} : memref<8x128xf32, #tpu.memory_space<vmem>>, vector<8x128xf32>,
    return
  }
}

</mosaic_0001>

<bundles_post_ra>
// kernel: tpu_custom_call.1
= control target key start
LH: loop header
LB: loop body
LE: loop exit
PB: predicated region body
PF: predicated region fallthrough
CT: control target
= control target key end

     0   :  { %20 = vsyncpa [#allocation3], 0  ;;  %s2036_s0 = inlined_call_operand.hbm [shape: f32[8,128], index: 0, kind: input, shape index: {}]   ;;  %s2037_s1 = inlined_call_operand.hbm [shape: f32[8,128], index: 1, kind: input, shape index: {}]   ;;  %s2038_s2 = inlined_call_operand.hbm [shape: f32[128,128], index: 2, kind: input, shape index: {}]   ;;  %s2039_s3 = inlined_call_operand.hbm [shape: f32[128,128], index: 3, kind: input, shape index: {}]   ;;  %s2040_s4 = inlined_call_operand.vmem [shape: f32[1,128], index: 4, kind: input, shape index: {}]   ;;  %s2041_s5 = inlined_call_operand.vmem [shape: f32[1,128], index: 5, kind: input, shape index: {}]   ;;  %s2042_s6 = inlined_call_operand.hbm [shape: f32[128,128], index: 6, kind: input, shape index: {}]   ;;  %s2043_s7 = inlined_call_operand.hbm [shape: f32[128,128], index: 7, kind: input, shape index: {}]   ;;  %s2044_s8 = inlined_call_operand.vmem [shape: f32[1,128], index: 8, kind: input, shape index: {}]   ;;  %s2045_s9 = inlined_call_operand.hbm [shape: f32[128,128], index: 9, kind: input, shape index: {}]   ;;  %s2046_s10 = inlined_call_operand.hbm [shape: f32[128,128], index: 10, kind: input, shape index: {}]   ;;  %s2047_s11 = inlined_call_operand.vmem [shape: f32[1,128], index: 11, kind: input, shape index: {}]   ;;  %s2048_s12 = inlined_call_operand.vmem [shape: f32[1,128], index: 12, kind: input, shape index: {}]   ;;  %s2049_s13 = inlined_call_operand.hbm [shape: f32[128,128], index: 13, kind: input, shape index: {}]   ;;  %s2050_s14 = inlined_call_operand.vmem [shape: f32[1,128], index: 14, kind: input, shape index: {}]   ;;  %s2051_s15 = inlined_call_operand.hbm [shape: f32[8,128], index: 15, kind: output, shape index: {}]  }
   0x1   :  { %21 = vsyncpa [#allocation6], 0 }
   0x2   :  { %22 = vsyncpa [#allocation9], 0 }
   0x3   :  { %23 = vsyncpa [#allocation12], 0 }
   0x4   :  { %24 = vsyncpa [#allocation15], 0 }
   0x5   :  { %25 = vsyncpa [#allocation4], 0  ;;  %s1735_s18 = smov [#allocation5]   ;;  %s1503_s22 = scalar_lea.hbm %s2037_s1, 128 }
   0x6   :  { %s42_s19 = sshll.u32 %s1735_s18, 4  ;;  %p1504_p0 = scmp.ne.s32.totalorder %s2037_s1, %s1503_s22  ;;  %s43_s19 = int_to_ptr.vmem [resolvable:$true] %s42_s19 }
   0x7   :  { %p1507_p1 = scmp.lt.u32.totalorder %s1503_s22, %s2037_s1 }
   0x9   :  { %p1509_p2 = pnand %p1507_p1, %p1504_p0 }
   0xb   :  { %1512 = shalt.err (!%p1509_p2)
}
   0xc   :  { %s1513_s27 = scalar_lea.vmem %s43_s19, 128  ;;  %p1518_p4 = scmp.lt.s32.totalorder %s43_s19, %s43_s19 }
   0xd   :  { %p1514_p3 = scmp.ne.s32.totalorder %s43_s19, %s1513_s27  ;;  %p1519_p5 = scmp.lt.s32.totalorder %s1513_s27, %s1513_s27 }
   0xf   :  { %p1520_p6 = por %p1519_p5, %p1518_p4 }
  0x11   :  { %p1521_p7 = pnand %p1520_p6, %p1514_p3 }
  0x13   :  { %1524 = shalt.err (!%p1521_p7)
}
  0x14   :  { %45 = dma.hbm_to_vmem [thread:$0]  %s2037_s1, 128, %s43_s19, [#allocation6]  }
  0x15   :  { %s1736_s30 = smov [#allocation8]   ;;  %s1737_s17 = smov [#allocation11]  }
  0x16   :  { %s63_s16 = sshll.u32 %s1736_s30, 4  ;;  %s91_s18 = sshll.u32 %s1737_s17, 4  ;;  %s64_s16 = int_to_ptr.vmem [resolvable:$true] %s63_s16  ;;  %s92_s18 = int_to_ptr.vmem [resolvable:$true] %s91_s18 }
  0x17   :  { %s1525_s22 = scalar_lea.hbm %s2039_s3, 2048 }
  0x18   :  { %p1526_p8 = scmp.ne.s32.totalorder %s2039_s3, %s1525_s22  ;;  %p1529_p9 = scmp.lt.u32.totalorder %s1525_s22, %s2039_s3 }
  0x1a   :  { %p1531_p10 = pnand %p1529_p9, %p1526_p8 }
  0x1c   :  { %1534 = shalt.err (!%p1531_p10)
}
  0x1d   :  { %s1535_s1 = scalar_lea.vmem %s64_s16, 2048  ;;  %p1540_p12 = scmp.lt.s32.totalorder %s64_s16, %s64_s16 }
  0x1e   :  { %p1536_p11 = scmp.ne.s32.totalorder %s64_s16, %s1535_s1  ;;  %p1541_p13 = scmp.lt.s32.totalorder %s1535_s1, %s1535_s1 }
  0x20   :  { %p1542_p0 = por %p1541_p13, %p1540_p12 }
  0x22   :  { %p1543_p1 = pnand %p1542_p0, %p1536_p11 }
  0x24   :  { %1546 = shalt.err (!%p1543_p1)
}
  0x25   :  { %s1738_s19 = smov 128   ;;  %s1739_s27 = smov 8  }
  0x26   :  { %69 = dma.hbm_to_vmem [thread:$0]  %s2039_s3, 2048, %s64_s16, [#allocation9], %s1738_s19, %s1738_s19, %s1739_s27  }
  0x27   :  { %s1547_s20 = scalar_lea.hbm %s2043_s7, 2048 }
  0x28   :  { %p1548_p2 = scmp.ne.s32.totalorder %s2043_s7, %s1547_s20  ;;  %p1551_p3 = scmp.lt.u32.totalorder %s1547_s20, %s2043_s7 }
  0x2a   :  { %p1553_p4 = pnand %p1551_p3, %p1548_p2 }
  0x2c   :  { %1556 = shalt.err (!%p1553_p4)
}
  0x2d   :  { %s1557_s25 = scalar_lea.vmem %s92_s18, 2048  ;;  %p1562_p6 = scmp.lt.s32.totalorder %s92_s18, %s92_s18 }
  0x2e   :  { %p1558_p5 = scmp.ne.s32.totalorder %s92_s18, %s1557_s25  ;;  %p1563_p7 = scmp.lt.s32.totalorder %s1557_s25, %s1557_s25 }
  0x30   :  { %p1564_p8 = por %p1563_p7, %p1562_p6 }
  0x32   :  { %p1565_p9 = pnand %p1564_p8, %p1558_p5 }
  0x34   :  { %1568 = shalt.err (!%p1565_p9)
}
  0x35   :  { %97 = dma.hbm_to_vmem [thread:$0]  %s2043_s7, 2048, %s92_s18, [#allocation12], %s1738_s19, %s1738_s19, %s1739_s27  }
  0x36   :  { %s1740_s26 = smov [#allocation14]   ;;  %s1741_s28 = smov [#allocation2]  }
  0x37   :  { %s117_s1 = sshll.u32 %s1740_s26, 4  ;;  %s32_s29 = sshll.u32 %s1741_s28, 4  ;;  %s118_s1 = int_to_ptr.vmem [resolvable:$true] %s117_s1  ;;  %s33_s29 = int_to_ptr.vmem [resolvable:$true] %s32_s29 }
  0x38   :  { %s1569_s20 = scalar_lea.hbm %s2046_s10, 2048 }
  0x39   :  { %p1570_p10 = scmp.ne.s32.totalorder %s2046_s10, %s1569_s20  ;;  %p1573_p11 = scmp.lt.u32.totalorder %s1569_s20, %s2046_s10 }
  0x3b   :  { %p1575_p12 = pnand %p1573_p11, %p1570_p10 }
  0x3d   :  { %1578 = shalt.err (!%p1575_p12)
}
  0x3e   :  { %s1579_s7 = scalar_lea.vmem %s118_s1, 2048  ;;  %p1584_p0 = scmp.lt.s32.totalorder %s118_s1, %s118_s1 }
  0x3f   :  { %p1580_p13 = scmp.ne.s32.totalorder %s118_s1, %s1579_s7  ;;  %p1585_p1 = scmp.lt.s32.totalorder %s1579_s7, %s1579_s7 }
  0x41   :  { %p1586_p2 = por %p1585_p1, %p1584_p0 }
  0x43   :  { %p1587_p3 = pnand %p1586_p2, %p1580_p13 }
  0x45   :  { %1590 = shalt.err (!%p1587_p3)
}
  0x46   :  { %123 = dma.hbm_to_vmem [thread:$0]  %s2046_s10, 2048, %s118_s1, [#allocation15], %s1738_s19, %s1738_s19, %s1739_s27  }
  0x47   :  { %s1591_s26 = scalar_lea.hbm %s2036_s0, 128 }
  0x48   :  { %p1592_p4 = scmp.ne.s32.totalorder %s2036_s0, %s1591_s26  ;;  %p1595_p5 = scmp.lt.u32.totalorder %s1591_s26, %s2036_s0 }
  0x4a   :  { %p1597_p6 = pnand %p1595_p5, %p1592_p4 }
  0x4c   :  { %1600 = shalt.err (!%p1597_p6)
}
  0x4d   :  { %s1601_s21 = scalar_lea.vmem %s33_s29, 128  ;;  %p1606_p8 = scmp.lt.s32.totalorder %s33_s29, %s33_s29 }
  0x4e   :  { %p1602_p7 = scmp.ne.s32.totalorder %s33_s29, %s1601_s21  ;;  %p1607_p9 = scmp.lt.s32.totalorder %s1601_s21, %s1601_s21 }
  0x50   :  { %p1608_p10 = por %p1607_p9, %p1606_p8 }
  0x52   :  { %p1609_p11 = pnand %p1608_p10, %p1602_p7 }
  0x54   :  { %1612 = shalt.err (!%p1609_p11)
}
  0x55   :  { %35 = dma.hbm_to_vmem [thread:$0]  %s2036_s0, 128, %s33_s29, [#allocation3]  }
  0x56   :  { %s1742_s22 = smov [#allocation7]   ;;  %s1743_s24 = smov [#allocation10]  }
  0x57   :  { %s51_s23 = sshll.u32 %s1742_s22, 4  ;;  %s79_s7 = sshll.u32 %s1743_s24, 4  ;;  %s52_s23 = int_to_ptr.vmem [resolvable:$true] %s51_s23  ;;  %s80_s7 = int_to_ptr.vmem [resolvable:$true] %s79_s7 }
  0x58   :  { %s1613_s3 = scalar_lea.hbm %s2038_s2, 2048 }
  0x59   :  { %p1614_p12 = scmp.ne.s32.totalorder %s2038_s2, %s1613_s3  ;;  %p1617_p13 = scmp.lt.u32.totalorder %s1613_s3, %s2038_s2 }
  0x5b   :  { %p1619_p0 = pnand %p1617_p13, %p1614_p12 }
  0x5d   :  { %1622 = shalt.err (!%p1619_p0)
}
  0x5e   :  { %s1623_s0 = scalar_lea.vmem %s52_s23, 2048  ;;  %p1628_p2 = scmp.lt.s32.totalorder %s52_s23, %s52_s23 }
  0x5f   :  { %p1624_p1 = scmp.ne.s32.totalorder %s52_s23, %s1623_s0  ;;  %p1629_p3 = scmp.lt.s32.totalorder %s1623_s0, %s1623_s0 }
  0x61   :  { %p1630_p4 = por %p1629_p3, %p1628_p2 }
  0x63   :  { %p1631_p5 = pnand %p1630_p4, %p1624_p1 }
  0x65   :  { %1634 = shalt.err (!%p1631_p5)
}
  0x66   :  { %57 = dma.hbm_to_vmem [thread:$0]  %s2038_s2, 2048, %s52_s23, [#allocation6], %s1738_s19, %s1738_s19, %s1739_s27  }
  0x67   :  { %s1635_s10 = scalar_lea.hbm %s2042_s6, 2048 }
  0x68   :  { %p1636_p6 = scmp.ne.s32.totalorder %s2042_s6, %s1635_s10  ;;  %p1639_p7 = scmp.lt.u32.totalorder %s1635_s10, %s2042_s6 }
  0x6a   :  { %p1641_p8 = pnand %p1639_p7, %p1636_p6 }
  0x6c   :  { %1644 = shalt.err (!%p1641_p8)
}
  0x6d   :  { %s1645_s25 = scalar_lea.vmem %s80_s7, 2048  ;;  %p1650_p10 = scmp.lt.s32.totalorder %s80_s7, %s80_s7 }
  0x6e   :  { %p1646_p9 = scmp.ne.s32.totalorder %s80_s7, %s1645_s25  ;;  %p1651_p11 = scmp.lt.s32.totalorder %s1645_s25, %s1645_s25 }
  0x70   :  { %p1652_p12 = por %p1651_p11, %p1650_p10 }
  0x72   :  { %p1653_p13 = pnand %p1652_p12, %p1646_p9 }
  0x74   :  { %1656 = shalt.err (!%p1653_p13)
}
  0x75   :  { %85 = dma.hbm_to_vmem [thread:$0]  %s2042_s6, 2048, %s80_s7, [#allocation9], %s1738_s19, %s1738_s19, %s1739_s27  }
  0x76   :  { %s1744_s3 = smov [#allocation13]   ;;  %s1745_s26 = smov [#allocation16]  }
  0x77   :  { %s105_s16 = sshll.u32 %s1744_s3, 4  ;;  %s133_s28 = sshll.u32 %s1745_s26, 4  ;;  %s106_s16 = int_to_ptr.vmem [resolvable:$true] %s105_s16  ;;  %s134_s28 = int_to_ptr.vmem [resolvable:$true] %s133_s28 }
  0x78   :  { %s1657_s29 = scalar_lea.hbm %s2045_s9, 2048 }
  0x79   :  { %p1658_p0 = scmp.ne.s32.totalorder %s2045_s9, %s1657_s29  ;;  %p1661_p1 = scmp.lt.u32.totalorder %s1657_s29, %s2045_s9 }
  0x7b   :  { %p1663_p2 = pnand %p1661_p1, %p1658_p0 }
  0x7d   :  { %1666 = shalt.err (!%p1663_p2)
}
  0x7e   :  { %s1667_s6 = scalar_lea.vmem %s106_s16, 2048  ;;  %p1672_p4 = scmp.lt.s32.totalorder %s106_s16, %s106_s16 }
  0x7f   :  { %p1668_p3 = scmp.ne.s32.totalorder %s106_s16, %s1667_s6  ;;  %p1673_p5 = scmp.lt.s32.totalorder %s1667_s6, %s1667_s6 }
  0x81   :  { %p1674_p6 = por %p1673_p5, %p1672_p4 }
  0x83   :  { %p1675_p7 = pnand %p1674_p6, %p1668_p3 }
  0x85   :  { %1678 = shalt.err (!%p1675_p7)
}
  0x86   :  { %111 = dma.hbm_to_vmem [thread:$0]  %s2045_s9, 2048, %s106_s16, [#allocation12], %s1738_s19, %s1738_s19, %s1739_s27  }
  0x87   :  { %s1679_s18 = scalar_lea.hbm %s2049_s13, 2048 }
  0x88   :  { %p1680_p8 = scmp.ne.s32.totalorder %s2049_s13, %s1679_s18  ;;  %p1683_p9 = scmp.lt.u32.totalorder %s1679_s18, %s2049_s13 }
  0x8a   :  { %p1685_p10 = pnand %p1683_p9, %p1680_p8 }
  0x8c   :  { %1688 = shalt.err (!%p1685_p10)
}
  0x8d   :  { %s1689_s26 = scalar_lea.vmem %s134_s28, 2048  ;;  %p1694_p12 = scmp.lt.s32.totalorder %s134_s28, %s134_s28 }
  0x8e   :  { %p1690_p11 = scmp.ne.s32.totalorder %s134_s28, %s1689_s26  ;;  %p1695_p13 = scmp.lt.s32.totalorder %s1689_s26, %s1689_s26 }
  0x90   :  { %p1696_p0 = por %p1695_p13, %p1694_p12 }
  0x92   :  { %p1697_p1 = pnand %p1696_p0, %p1690_p11 }
  0x94   :  { %1700 = shalt.err (!%p1697_p1)
}
  0x95   :  { %139 = dma.hbm_to_vmem [thread:$0]  %s2049_s13, 2048, %s134_s28, [#allocation15], %s1738_s19, %s1738_s19, %s1739_s27  }
  0x96   :  { %1723 = dma.done.wait [#allocation3], 128  }
  0x97   :  { %1724 = vsyncadd [#allocation3], 4294967168 }
  0x98   :  { %1725 = dma.done.wait [#allocation6], 2176  }
  0x99   :  { %1726 = vsyncadd [#allocation6], 4294965120 }
  0x9a   :  { %1727 = dma.done.wait [#allocation9], 4096  }
  0x9b   :  { %1728 = vsyncadd [#allocation9], 4294963200 }
  0x9c   :  { %1729 = dma.done.wait [#allocation12], 4096  }
  0x9d   :  { %1730 = vsyncadd [#allocation12], 4294963200 }
  0x9e   :  { %1731 = dma.done.wait [#allocation15], 4096  }
  0x9f   :  { %1732 = vsyncadd [#allocation15], 4294963200  ;;  %v171_v0 = vld [vmem:[#allocation7] sm:$0xff]  ;;  %v172_v1 = vld [vmem:[#allocation7 + $0x8] sm:$0xff]  ;;  %v1746_v60 = vmov 0.0|0.0   ;;  %vm1747_vm0 = vmmov 0  }
  0xa0   :  { %v173_v2 = vld [vmem:[#allocation7 + $0x10] sm:$0xff]  ;;  %v1272_v3 = vpack.c.bf16 %v172_v1, %v171_v0  ;;  %v174_v4 = vld [vmem:[#allocation7 + $0x18] sm:$0xff]  ;;  %v175_v6 = vld [vmem:[#allocation7 + $0x20] sm:$0xff] }
  0xa1   :  { %v1276_v5 = vpack.c.bf16 %v174_v4, %v173_v2  ;;  %v176_v7 = vld [vmem:[#allocation7 + $0x28] sm:$0xff]  ;;  %v177_v8 = vld [vmem:[#allocation7 + $0x30] sm:$0xff]  ;;  %v178_v10 = vld [vmem:[#allocation7 + $0x38] sm:$0xff] }
  0xa2   :  { %1273 = vmatprep.subr.bf16.mxu0 %v1272_v3  ;;  %v1280_v9 = vpack.c.bf16 %v176_v7, %v175_v6  ;;  %v1959_v11 = vld [vmem:[#allocation2] sm:$0xff]  ;;  %v187_v12 = vld [vmem:[#allocation8] sm:$0xff]  ;;  %v188_v13 = vld [vmem:[#allocation8 + $0x8] sm:$0xff]  ;;  %v1284_v20 = vpack.c.bf16 %v178_v10, %v177_v8 }
  0xa3   :  { %1275 = vmatpush3.bf16.msra.mxu0 %v1272_v3  ;;  %1059 = vmatprep.mubr.f32.mxu0 %v1959_v11  ;;  %v189_v14 = vld [vmem:[#allocation8 + $0x10] sm:$0xff]  ;;  %v190_v15 = vld [vmem:[#allocation8 + $0x18] sm:$0xff]  ;;  %v1304_v16 = vpack.c.bf16 %v188_v13, %v187_v12  ;;  %v191_v18 = vld [vmem:[#allocation8 + $0x20] sm:$0xff]  ;;  %v289_v43 = vmul.f32 %v1959_v11, %v1959_v11 }
  0xa4   :  { %1277 = vmatprep.subr.bf16.mxu0 %v1276_v5  ;;  %v1308_v17 = vpack.c.bf16 %v190_v15, %v189_v14  ;;  %v192_v19 = vld [vmem:[#allocation8 + $0x28] sm:$0xff]  ;;  %v179_v21 = vld [vmem:[#allocation7 + $0x40] sm:$0xff]  ;;  %v193_v24 = vld [vmem:[#allocation8 + $0x30] sm:$0xff] }
  0xa5   :  { %1305 = vmatprep.subr.bf16.mxu1 %v1304_v16  ;;  %v180_v22 = vld [vmem:[#allocation7 + $0x48] sm:$0xff]  ;;  %v1312_v23 = vpack.c.bf16 %v192_v19, %v191_v18  ;;  %v194_v25 = vld [vmem:[#allocation8 + $0x38] sm:$0xff]  ;;  %v181_v27 = vld [vmem:[#allocation7 + $0x50] sm:$0xff] }
  0xa6   :  { %1307 = vmatpush3.bf16.msra.mxu1 %v1304_v16  ;;  %v1288_v26 = vpack.c.bf16 %v180_v22, %v179_v21  ;;  %v182_v28 = vld [vmem:[#allocation7 + $0x58] sm:$0xff]  ;;  %v1316_v29 = vpack.c.bf16 %v194_v25, %v193_v24  ;;  %v195_v30 = vld [vmem:[#allocation8 + $0x40] sm:$0xff]  ;;  %v196_v31 = vld [vmem:[#allocation8 + $0x48] sm:$0xff] }
  0xa7   :  { %1279 = vmatpush3.bf16.msra.mxu0 %v1276_v5  ;;  %1309 = vmatprep.subr.bf16.mxu1 %v1308_v17  ;;  %v1292_v32 = vpack.c.bf16 %v182_v28, %v181_v27  ;;  %v183_v33 = vld [vmem:[#allocation7 + $0x60] sm:$0xff]  ;;  %v184_v34 = vld [vmem:[#allocation7 + $0x68] sm:$0xff]  ;;  %v1320_v35 = vpack.c.bf16 %v196_v31, %v195_v30  ;;  %v197_v36 = vld [vmem:[#allocation8 + $0x50] sm:$0xff] }
  0xa8   :  { %1281 = vmatprep.subr.bf16.mxu0 %v1280_v9  ;;  %v198_v37 = vld [vmem:[#allocation8 + $0x58] sm:$0xff]  ;;  %v1296_v38 = vpack.c.bf16 %v184_v34, %v183_v33  ;;  %v185_v39 = vld [vmem:[#allocation7 + $0x70] sm:$0xff]  ;;  %v199_v44 = vld [vmem:[#allocation8 + $0x60] sm:$0xff] }
  0xa9   :  { %v186_v40 = vld [vmem:[#allocation7 + $0x78] sm:$0xff]  ;;  %v1324_v41 = vpack.c.bf16 %v198_v37, %v197_v36  ;;  %v200_v45 = vld [vmem:[#allocation8 + $0x68] sm:$0xff]  ;;  %v201_v47 = vld [vmem:[#allocation8 + $0x70] sm:$0xff] }
  0xaa   :  { %1311 = vmatpush3.bf16.msra.mxu1 %v1308_v17  ;;  %v1300_v42 = vpack.c.bf16 %v186_v40, %v185_v39  ;;  %v1328_v46 = vpack.c.bf16 %v200_v45, %v199_v44  ;;  %v202_v48 = vld [vmem:[#allocation8 + $0x78] sm:$0xff]  ;;  %v221_v55 = vld [vmem:[#allocation11] sm:$0xff]  ;;  %v222_v56 = vld [vmem:[#allocation11 + $0x8] sm:$0xff]  ;;  %v1748_v39 = vmov 0.0  }
  0xab   :  { %1283 = vmatpush3.bf16.msra.mxu0 %v1280_v9  ;;  %1313 = vmatprep.subr.bf16.mxu1 %v1312_v23  ;;  %v1332_v49 = vpack.c.bf16 %v202_v48, %v201_v47  ;;  %v1337_v57 = vpack.c.bf16 %v222_v56, %v221_v55  ;;  %v205_v58 = vld [vmem:[#allocation10] sm:$0xff]  ;;  %v206_v59 = vld [vmem:[#allocation10 + $0x8] sm:$0xff]  ;;  %v1966_v62 = vld [vmem:[#allocation5] sm:$0xff] }
  0xac   :  { %1285 = vmatprep.subr.bf16.mxu0 %v1284_v20  ;;  %v1361_v61 = vpack.c.bf16 %v206_v59, %v205_v58  ;;  %v223_v63 = vld [vmem:[#allocation11 + $0x10] sm:$0xff]  ;;  %v224_v0 = vld [vmem:[#allocation11 + $0x18] sm:$0xff]  ;;  %v468_v1 = vsub.f32 0.0, %v1966_v62  ;;  %v225_v7 = vld [vmem:[#allocation11 + $0x20] sm:$0xff] }
  0xad   :  { %v1340_v2 = vpack.c.bf16 %v224_v0, %v223_v63  ;;  %v207_v3 = vld [vmem:[#allocation10 + $0x10] sm:$0xff]  ;;  %v208_v4 = vld [vmem:[#allocation10 + $0x18] sm:$0xff]  ;;  %v226_v8 = vld [vmem:[#allocation11 + $0x28] sm:$0xff] }
  0xae   :  { %1315 = vmatpush3.bf16.msra.mxu1 %v1312_v23  ;;  %v1364_v5 = vpack.c.bf16 %v208_v4, %v207_v3  ;;  %v469_v6 = vmul.f32 1.442695, %v468_v1  ;;  %v1343_v9 = vpack.c.bf16 %v226_v8, %v225_v7  ;;  %v209_v10 = vld [vmem:[#allocation10 + $0x20] sm:$0xff]  ;;  %v210_v12 = vld [vmem:[#allocation10 + $0x28] sm:$0xff]  ;;  %v227_v14 = vld [vmem:[#allocation11 + $0x30] sm:$0xff] }
  0xaf   :  { %1287 = vmatpush3.bf16.msra.mxu0 %v1284_v20  ;;  %1317 = vmatprep.subr.bf16.mxu1 %v1316_v29  ;;  %v1367_v13 = vpack.c.bf16 %v210_v12, %v209_v10  ;;  %v228_v15 = vld [vmem:[#allocation11 + $0x38] sm:$0xff]  ;;  %v211_v17 = vld [vmem:[#allocation10 + $0x30] sm:$0xff]  ;;  %v229_v20 = vld [vmem:[#allocation11 + $0x40] sm:$0xff] }
  0xb0   :  { %1289 = vmatprep.subr.bf16.mxu0 %v1288_v26  ;;  %1487 = vpow2.f32 %v469_v6  ;;  %v1346_v16 = vpack.c.bf16 %v228_v15, %v227_v14  ;;  %v212_v18 = vld [vmem:[#allocation10 + $0x38] sm:$0xff]  ;;  %v230_v21 = vld [vmem:[#allocation11 + $0x48] sm:$0xff]  ;;  %v213_v23 = vld [vmem:[#allocation10 + $0x40] sm:$0xff] }
  0xb1   :  { %v1370_v19 = vpack.c.bf16 %v212_v18, %v211_v17  ;;  %v1349_v22 = vpack.c.bf16 %v230_v21, %v229_v20  ;;  %v214_v24 = vld [vmem:[#allocation10 + $0x48] sm:$0xff]  ;;  %v231_v28 = vld [vmem:[#allocation11 + $0x50] sm:$0xff]  ;;  %v233_v34 = vld [vmem:[#allocation11 + $0x60] sm:$0xff] }
  0xb2   :  { %1319 = vmatpush3.bf16.msra.mxu1 %v1316_v29  ;;  %v232_v29 = vld [vmem:[#allocation11 + $0x58] sm:$0xff]  ;;  %v215_v31 = vld [vmem:[#allocation10 + $0x50] sm:$0xff]  ;;  %v217_v36 = vld [vmem:[#allocation10 + $0x60] sm:$0xff] }
  0xb3   :  { %1291 = vmatpush3.bf16.msra.mxu0 %v1288_v26  ;;  %1321 = vmatprep.subr.bf16.mxu1 %v1320_v35  ;;  %v1373_v26 = vpack.c.bf16 %v214_v24, %v213_v23  ;;  %v1352_v30 = vpack.c.bf16 %v232_v29, %v231_v28  ;;  %v220_v44 = vld [vmem:[#allocation10 + $0x78] sm:$0xff]  ;;  %v242_v55 = vld [vmem:[#allocation13 + $0x20] sm:$0xff]  ;;  %v243_v56 = vld [vmem:[#allocation13 + $0x28] sm:$0xff] }
  0xb4   :  { %1293 = vmatprep.subr.bf16.mxu0 %v1292_v32  ;;  %v244_v58 = vld [vmem:[#allocation13 + $0x30] sm:$0xff]  ;;  %v245_v59 = vld [vmem:[#allocation13 + $0x38] sm:$0xff]  ;;  %v246_v63 = vld [vmem:[#allocation13 + $0x40] sm:$0xff] }
  0xb5   :  { %v248_v1 = vld [vmem:[#allocation13 + $0x50] sm:$0xff]  ;;  %v250_v7 = vld [vmem:[#allocation13 + $0x60] sm:$0xff]  ;;  %v251_v8 = vld [vmem:[#allocation13 + $0x68] sm:$0xff] }
  0xb6   :  { %1323 = vmatpush3.bf16.msra.mxu1 %v1320_v35  ;;  %v234_v35 = vld [vmem:[#allocation11 + $0x68] sm:$0xff]  ;;  %v899_v15 = vld [vmem:[%s2041_s5] ss:$0 sm:$0xff]  ;;  %v254_v29 = vld [vmem:[#allocation14] sm:$0xff] }
  0xb7   :  { %1295 = vmatpush3.bf16.msra.mxu0 %v1292_v32  ;;  %1325 = vmatprep.subr.bf16.mxu1 %v1324_v41  ;;  %v216_v32 = vld [vmem:[#allocation10 + $0x58] sm:$0xff]  ;;  %v1355_v37 = vpack.c.bf16 %v234_v35, %v233_v34  ;;  %v258_v35 = vld [vmem:[#allocation14 + $0x20] sm:$0xff] }
  0xb8   :  { %1297 = vmatprep.subr.bf16.mxu0 %v1296_v38  ;;  %v1376_v33 = vpack.c.bf16 %v216_v32, %v215_v31  ;;  %v256_v31 = vld [vmem:[#allocation14 + $0x10] sm:$0xff] }
  0xba   :  { %1327 = vmatpush3.bf16.msra.mxu1 %v1324_v41  ;;  %v1488_v25 = vpop.eup %1487  ;;  %v235_v41 = vld [vmem:[#allocation11 + $0x70] sm:$0xff] }
  0xbb   :  { %1299 = vmatpush3.bf16.msra.mxu0 %v1296_v38  ;;  %1329 = vmatprep.subr.bf16.mxu1 %v1328_v46  ;;  %v471_v27 = vadd.f32 1.0, %v1488_v25  ;;  %v218_v38 = vld [vmem:[#allocation10 + $0x68] sm:$0xff] }
  0xbc   :  { %1301 = vmatprep.subr.bf16.mxu0 %v1300_v42  ;;  %v1379_v40 = vpack.c.bf16 %v218_v38, %v217_v36  ;;  %v259_v36 = vld [vmem:[#allocation14 + $0x28] sm:$0xff]  ;;  %v260_v38 = vld [vmem:[#allocation14 + $0x30] sm:$0xff] }
  0xbd   :  { %1489 = vrcp.f32 %v471_v27  ;;  %v253_v27 = vld [vmem:[#allocation13 + $0x78] sm:$0xff] }
  0xbe   :  { %1331 = vmatpush3.bf16.msra.mxu1 %v1328_v46 }
  0xbf   :  { %1303 = vmatpush3.bf16.msra.mxu0 %v1300_v42  ;;  %1333 = vmatprep.subr.bf16.mxu1 %v1332_v49  ;;  %v236_v42 = vld [vmem:[#allocation11 + $0x78] sm:$0xff] }
  0xc0   :  { %1336 = vmatprep.subr.bf16.mxu0 %v1746_v60  ;;  %v1358_v45 = vpack.c.bf16 %v236_v42, %v235_v41  ;;  %v262_v42 = vld [vmem:[#allocation14 + $0x40] sm:$0xff] }
  0xc2   :  { %1060 = vmatmul.mubr.f32.vlgmr.msra.gmra.mrb[0].mxu0 %v289_v43  ;;  %1335 = vmatpush3.bf16.msra.mxu1 %v1332_v49  ;;  %v219_v43 = vld [vmem:[#allocation10 + $0x70] sm:$0xff]  ;;  %v238_v49 = vld [vmem:[#allocation13] sm:$0xff] }
  0xc3   :  { %1360 = vmatprep.subr.bf16.mxu1 %v1746_v60  ;;  %1338 = vmatpush3.bf16.msra.mxu0 %v1337_v57  ;;  %v1382_v46 = vpack.c.bf16 %v220_v44, %v219_v43  ;;  %v1392_v57 = vpack.c.bf16 %v243_v56, %v242_v55  ;;  %v263_v43 = vld [vmem:[#allocation14 + $0x48] sm:$0xff] }
  0xc4   :  { %1339 = vmatprep.subr.bf16.mxu0 %v1746_v60  ;;  %1129 = vmatprep.mubr.msk.f32.mxu0 %vm1747_vm0, %v1748_v39  ;;  %v1432_v44 = vpack.c.bf16 %v263_v43, %v262_v42  ;;  %v267_v55 = vld [vmem:[#allocation14 + $0x68] sm:$0xff]  ;;  %v903_v42 = vld [vmem:[%s2050_s14] ss:$0 sm:$0xff] }
  0xc7   :  { %1341 = vmatpush3.bf16.msra.mxu0 %v1340_v2  ;;  %v1490_v47 = vpop.eup %1489  ;;  %v249_v2 = vld [vmem:[#allocation13 + $0x58] sm:$0xff] }
  0xc8   :  { %1342 = vmatprep.subr.bf16.mxu0 %v1746_v60  ;;  %v474_v48 = vmul.f32 %v1490_v47, %v1966_v62  ;;  %v247_v62 = vld [vmem:[#allocation13 + $0x48] sm:$0xff]  ;;  %v1404_v3 = vpack.c.bf16 %v249_v2, %v248_v1  ;;  %v272_v2 = vld [vmem:[#allocation16] sm:$0xff] }
  0xc9   :  { %v1400_v0 = vpack.c.bf16 %v247_v62, %v246_v63 }
  0xcb   :  { %1344 = vmatpush3.bf16.msra.mxu0 %v1343_v9  ;;  %v1408_v9 = vpack.c.bf16 %v251_v8, %v250_v7  ;;  %v276_v7 = vld [vmem:[#allocation16 + $0x20] sm:$0xff]  ;;  %v277_v8 = vld [vmem:[#allocation16 + $0x28] sm:$0xff] }
  0xcc   :  { %1345 = vmatprep.subr.bf16.mxu0 %v1746_v60 }
  0xcf   :  { %1347 = vmatpush3.bf16.msra.mxu0 %v1346_v16 }
  0xd0   :  { %1348 = vmatprep.subr.bf16.mxu0 %v1746_v60 }
  0xd3   :  { %1350 = vmatpush3.bf16.msra.mxu0 %v1349_v22 }
  0xd4   :  { %1351 = vmatprep.subr.bf16.mxu0 %v1746_v60 }
  0xd7   :  { %1353 = vmatpush3.bf16.msra.mxu0 %v1352_v30  ;;  %v255_v30 = vld [vmem:[#allocation14 + $0x8] sm:$0xff] }
  0xd8   :  { %1354 = vmatprep.subr.bf16.mxu0 %v1746_v60  ;;  %v1416_v32 = vpack.c.bf16 %v255_v30, %v254_v29 }
  0xdb   :  { %1356 = vmatpush3.bf16.msra.mxu0 %v1355_v37  ;;  %v1424_v37 = vpack.c.bf16 %v259_v36, %v258_v35 }
  0xdc   :  { %1357 = vmatprep.subr.bf16.mxu0 %v1746_v60 }
  0xdf   :  { %1359 = vmatpush3.bf16.msra.mxu0 %v1358_v45  ;;  %v264_v45 = vld [vmem:[#allocation14 + $0x50] sm:$0xff] }
  0xe2   :  { %1130 = vmatmul.mubr.f32.vlgmr.msra.gmra.mrb[2].mxu0 %v474_v48  ;;  %v900_v48 = vld [vmem:[%s2044_s8] ss:$0 sm:$0xff] }
 0x195   :  { %v1061_v50 = vpop.f32.mrb[0].mxu0 }
 0x196   :  { %v356_v51 = vpop.f32.mrb[1].mxu0 }
 0x197   :  { %v365_v52 = vmul.f32 %v356_v51, %v356_v51  ;;  %1094 = vmatprep.mubr.f32.mxu1 %v356_v51  ;;  %v240_v51 = vld [vmem:[#allocation13 + $0x10] sm:$0xff] }
 0x199   :  { %v366_v53 = vsub.f32 %v1061_v50, %v365_v52  ;;  %v239_v50 = vld [vmem:[#allocation13 + $0x8] sm:$0xff] }
 0x19a   :  { %v1384_v52 = vpack.c.bf16 %v239_v50, %v238_v49 }
 0x19b   :  { %v367_v54 = vmax.f32 %v366_v53, 0.0  ;;  %v241_v53 = vld [vmem:[#allocation13 + $0x18] sm:$0xff] }
 0x19c   :  { %1385 = vmatprep.subr.bf16.mxu0 %v1384_v52 }
 0x19d   :  { %1095 = vmatmul.mubr.f32.vlgmr.msra.gmra.mrb[0].mxu1 %v367_v54  ;;  %v1388_v54 = vpack.c.bf16 %v241_v53, %v240_v51  ;;  %1387 = vmatpush3.bf16.msra.mxu0 %v1384_v52 }
 0x19e   :  { %1362 = vmatpush3.bf16.msra.mxu1 %v1361_v61  ;;  %1164 = vmatprep.mubr.msk.f32.mxu1 %vm1747_vm0, %v1748_v39  ;;  %v1396_v61 = vpack.c.bf16 %v245_v59, %v244_v58  ;;  %v269_v58 = vld [vmem:[#allocation14 + $0x78] sm:$0xff] }
 0x19f   :  { %1363 = vmatprep.subr.bf16.mxu1 %v1746_v60  ;;  %1389 = vmatprep.subr.bf16.mxu0 %v1388_v54 }
 0x1a1   :  { %1391 = vmatpush3.bf16.msra.mxu0 %v1388_v54  ;;  %v266_v54 = vld [vmem:[#allocation14 + $0x60] sm:$0xff] }
 0x1a2   :  { %1365 = vmatpush3.bf16.msra.mxu1 %v1364_v5  ;;  %1393 = vmatprep.subr.bf16.mxu0 %v1392_v57  ;;  %v1440_v56 = vpack.c.bf16 %v267_v55, %v266_v54 }
 0x1a3   :  { %1366 = vmatprep.subr.bf16.mxu1 %v1746_v60 }
 0x1a5   :  { %1395 = vmatpush3.bf16.msra.mxu0 %v1392_v57  ;;  %v268_v57 = vld [vmem:[#allocation14 + $0x70] sm:$0xff] }
 0x1a6   :  { %1368 = vmatpush3.bf16.msra.mxu1 %v1367_v13  ;;  %1397 = vmatprep.subr.bf16.mxu0 %v1396_v61  ;;  %v898_v13 = vld [vmem:[%s2040_s4] ss:$0 sm:$0xff]  ;;  %v1444_v59 = vpack.c.bf16 %v269_v58, %v268_v57 }
 0x1a7   :  { %1369 = vmatprep.subr.bf16.mxu1 %v1746_v60 }
 0x1a9   :  { %1399 = vmatpush3.bf16.msra.mxu0 %v1396_v61 }
 0x1aa   :  { %1371 = vmatpush3.bf16.msra.mxu1 %v1370_v19  ;;  %1401 = vmatprep.subr.bf16.mxu0 %v1400_v0 }
 0x1ab   :  { %1372 = vmatprep.subr.bf16.mxu1 %v1746_v60 }
 0x1ad   :  { %1403 = vmatpush3.bf16.msra.mxu0 %v1400_v0 }
 0x1ae   :  { %1374 = vmatpush3.bf16.msra.mxu1 %v1373_v26  ;;  %1405 = vmatprep.subr.bf16.mxu0 %v1404_v3  ;;  %v252_v26 = vld [vmem:[#allocation13 + $0x70] sm:$0xff] }
 0x1af   :  { %1375 = vmatprep.subr.bf16.mxu1 %v1746_v60  ;;  %v1412_v28 = vpack.c.bf16 %v253_v27, %v252_v26 }
 0x1b1   :  { %1407 = vmatpush3.bf16.msra.mxu0 %v1404_v3  ;;  %v273_v3 = vld [vmem:[#allocation16 + $0x8] sm:$0xff] }
 0x1b2   :  { %1377 = vmatpush3.bf16.msra.mxu1 %v1376_v33  ;;  %1409 = vmatprep.subr.bf16.mxu0 %v1408_v9  ;;  %v257_v33 = vld [vmem:[#allocation14 + $0x18] sm:$0xff] }
 0x1b3   :  { %1378 = vmatprep.subr.bf16.mxu1 %v1746_v60  ;;  %v1420_v34 = vpack.c.bf16 %v257_v33, %v256_v31  ;;  %v901_v31 = vld [vmem:[%s2047_s11] ss:$0 sm:$0xff]  ;;  %s1749_s11 = smov [#allocation17]  }
 0x1b4   :  { %v902_v33 = vld [vmem:[%s2048_s12] ss:$0 sm:$0xff]  ;;  %s885_s21 = sshll.u32 %s1749_s11, 4  ;;  %s886_s21 = int_to_ptr.vmem [resolvable:$true] %s885_s21 }
 0x1b5   :  { %1411 = vmatpush3.bf16.msra.mxu0 %v1408_v9  ;;  %v541_v24 = vpop.f32.mrb[2].mxu0  ;;  %v1455_v9 = vpack.c.bf16 %v277_v8, %v276_v7  ;;  %s1701_s12 = scalar_lea.vmem %s886_s21, 128  ;;  %p1706_p3 = scmp.lt.s32.totalorder %s886_s21, %s886_s21 }
 0x1b6   :  { %1380 = vmatpush3.bf16.msra.mxu1 %v1379_v40  ;;  %v1131_v25 = vpop.f32.mrb[3].mxu0  ;;  %1413 = vmatprep.subr.bf16.mxu0 %v1412_v28  ;;  %v261_v40 = vld [vmem:[#allocation14 + $0x38] sm:$0xff]  ;;  %p1702_p2 = scmp.ne.s32.totalorder %s886_s21, %s1701_s12  ;;  %p1707_p4 = scmp.lt.s32.totalorder %s1701_s12, %s1701_s12 }
 0x1b7   :  { %1381 = vmatprep.subr.bf16.mxu1 %v1746_v60  ;;  %v1428_v41 = vpack.c.bf16 %v261_v40, %v260_v38 }
 0x1b8   :  { %p1708_p5 = por %p1707_p4, %p1706_p3 }
 0x1b9   :  { %1415 = vmatpush3.bf16.msra.mxu0 %v1412_v28 }
 0x1ba   :  { %1383 = vmatpush3.bf16.msra.mxu1 %v1382_v46  ;;  %1448 = vmatprep.subr.bf16.mxu0 %v1746_v60  ;;  %v265_v46 = vld [vmem:[#allocation14 + $0x58] sm:$0xff]  ;;  %p1709_p6 = pnand %p1708_p5, %p1702_p2 }
 0x1bb   :  { %1417 = vmatprep.subr.bf16.mxu1 %v1416_v32  ;;  %v1436_v47 = vpack.c.bf16 %v265_v46, %v264_v45 }
 0x270   :  { %v1096_v4 = vpop.f32.mrb[0].mxu1 }
 0x271   :  { %v444_v5 = vadd.f32 1e-05, %v1096_v4  ;;  %v434_v6 = vpop.f32.mrb[1].mxu1  ;;  %v274_v4 = vld [vmem:[#allocation16 + $0x10] sm:$0xff] }
 0x272   :  { %v443_v10 = vsub.f32 %v1959_v11, %v434_v6 }
 0x273   :  { %1491 = vrsqrt.f32 %v444_v5  ;;  %v275_v5 = vld [vmem:[#allocation16 + $0x18] sm:$0xff] }
 0x274   :  { %v1452_v6 = vpack.c.bf16 %v275_v5, %v274_v4 }
 0x27d   :  { %v1492_v12 = vpop.eup %1491 }
 0x27e   :  { %v446_v14 = vmul.f32 %v1492_v12, %v443_v10  ;;  %v278_v10 = vld [vmem:[#allocation16 + $0x30] sm:$0xff]  ;;  %v279_v12 = vld [vmem:[#allocation16 + $0x38] sm:$0xff] }
 0x280   :  { %v453_v16 = vmul.f32 %v898_v13, %v446_v14  ;;  %v1458_v13 = vpack.c.bf16 %v279_v12, %v278_v10  ;;  %v280_v14 = vld [vmem:[#allocation16 + $0x40] sm:$0xff] }
 0x282   :  { %v460_v17 = vadd.f32 %v899_v15, %v453_v16  ;;  %v281_v15 = vld [vmem:[#allocation16 + $0x48] sm:$0xff] }
 0x283   :  { %v1461_v16 = vpack.c.bf16 %v281_v15, %v280_v14 }
 0x284   :  { %v461_v18 = vsub.f32 0.0, %v460_v17 }
 0x286   :  { %v462_v19 = vmul.f32 1.442695, %v461_v18  ;;  %v283_v18 = vld [vmem:[#allocation16 + $0x58] sm:$0xff] }
 0x288   :  { %1493 = vpow2.f32 %v462_v19 }
 0x292   :  { %v1494_v20 = vpop.eup %1493 }
 0x293   :  { %v464_v21 = vadd.f32 1.0, %v1494_v20  ;;  %v284_v20 = vld [vmem:[#allocation16 + $0x60] sm:$0xff] }
 0x295   :  { %1495 = vrcp.f32 %v464_v21  ;;  %v285_v21 = vld [vmem:[#allocation16 + $0x68] sm:$0xff] }
 0x29f   :  { %v1496_v22 = vpop.eup %1495 }
 0x2a0   :  { %v467_v23 = vmul.f32 %v1496_v22, %v460_v17  ;;  %v282_v17 = vld [vmem:[#allocation16 + $0x50] sm:$0xff]  ;;  %v1467_v22 = vpack.c.bf16 %v285_v21, %v284_v20 }
 0x2a1   :  { %v1464_v19 = vpack.c.bf16 %v283_v18, %v282_v17 }
 0x2a2   :  { %1165 = vmatmul.mubr.f32.vlgmr.msra.gmra.mrb[2].mxu1 %v467_v23  ;;  %v286_v23 = vld [vmem:[#allocation16 + $0x70] sm:$0xff] }
 0x2a3   :  { %1419 = vmatpush3.bf16.msra.mxu1 %v1416_v32 }
 0x2a4   :  { %1421 = vmatprep.subr.bf16.mxu1 %v1420_v34 }
 0x2a7   :  { %1423 = vmatpush3.bf16.msra.mxu1 %v1420_v34 }
 0x2a8   :  { %1425 = vmatprep.subr.bf16.mxu1 %v1424_v37 }
 0x2ab   :  { %1427 = vmatpush3.bf16.msra.mxu1 %v1424_v37 }
 0x2ac   :  { %1429 = vmatprep.subr.bf16.mxu1 %v1428_v41 }
 0x2af   :  { %1431 = vmatpush3.bf16.msra.mxu1 %v1428_v41 }
 0x2b0   :  { %1433 = vmatprep.subr.bf16.mxu1 %v1432_v44 }
 0x2b3   :  { %1435 = vmatpush3.bf16.msra.mxu1 %v1432_v44 }
 0x2b4   :  { %1437 = vmatprep.subr.bf16.mxu1 %v1436_v47 }
 0x2b7   :  { %1439 = vmatpush3.bf16.msra.mxu1 %v1436_v47 }
 0x2b8   :  { %1441 = vmatprep.subr.bf16.mxu1 %v1440_v56 }
 0x2bb   :  { %1443 = vmatpush3.bf16.msra.mxu1 %v1440_v56 }
 0x2bc   :  { %1445 = vmatprep.subr.bf16.mxu1 %v1444_v59 }
 0x2bf   :  { %1447 = vmatpush3.bf16.msra.mxu1 %v1444_v59 }
 0x375   :  { %v611_v49 = vpop.f32.mrb[2].mxu1 }
 0x376   :  { %v612_v50 = vadd.f32 %v611_v49, %v541_v24  ;;  %v1166_v51 = vpop.f32.mrb[3].mxu1  ;;  %v287_v24 = vld [vmem:[#allocation16 + $0x78] sm:$0xff] }
 0x377   :  { %v1470_v25 = vpack.c.bf16 %v287_v24, %v286_v23 }
 0x378   :  { %v1999_v52 = vadd.f32 %v900_v48, %v612_v50 }
 0x37a   :  { %v622_v53 = vmul.f32 %v1999_v52, %v1999_v52  ;;  %1199 = vmatprep.mubr.f32.mxu0 %v1999_v52 }
 0x37c   :  { %1200 = vmatmul.mubr.f32.vlgmr.msra.gmra.mrb[4].mxu0 %v622_v53 }
 0x37d   :  { %1269 = vmatprep.mubr.msk.f32.mxu0 %vm1747_vm0, %v1748_v39  ;;  %v1449_v39 = vpack.c.bf16 %v273_v3, %v272_v2 }
 0x37f   :  { %1450 = vmatpush3.bf16.msra.mxu0 %v1449_v39 }
 0x380   :  { %1451 = vmatprep.subr.bf16.mxu0 %v1746_v60 }
 0x383   :  { %1453 = vmatpush3.bf16.msra.mxu0 %v1452_v6 }
 0x384   :  { %1454 = vmatprep.subr.bf16.mxu0 %v1746_v60 }
 0x387   :  { %1456 = vmatpush3.bf16.msra.mxu0 %v1455_v9 }
 0x388   :  { %1457 = vmatprep.subr.bf16.mxu0 %v1746_v60 }
 0x38b   :  { %1459 = vmatpush3.bf16.msra.mxu0 %v1458_v13 }
 0x38c   :  { %1460 = vmatprep.subr.bf16.mxu0 %v1746_v60 }
 0x38f   :  { %1462 = vmatpush3.bf16.msra.mxu0 %v1461_v16 }
 0x390   :  { %1463 = vmatprep.subr.bf16.mxu0 %v1746_v60 }
 0x393   :  { %1465 = vmatpush3.bf16.msra.mxu0 %v1464_v19 }
 0x394   :  { %1466 = vmatprep.subr.bf16.mxu0 %v1746_v60 }
 0x397   :  { %1468 = vmatpush3.bf16.msra.mxu0 %v1467_v22 }
 0x398   :  { %1469 = vmatprep.subr.bf16.mxu0 %v1746_v60 }
 0x39b   :  { %1471 = vmatpush3.bf16.msra.mxu0 %v1470_v25 }
 0x44f   :  { %v1201_v61 = vpop.f32.mrb[4].mxu0 }
 0x450   :  { %v689_v63 = vpop.f32.mrb[5].mxu0 }
 0x451   :  { %v698_v62 = vmul.f32 %v689_v63, %v689_v63  ;;  %1234 = vmatprep.mubr.f32.mxu1 %v689_v63 }
 0x453   :  { %v699_v0 = vsub.f32 %v1201_v61, %v698_v62 }
 0x455   :  { %v700_v1 = vmax.f32 %v699_v0, 0.0 }
 0x457   :  { %1235 = vmatmul.mubr.f32.vlgmr.msra.gmra.mrb[4].mxu1 %v700_v1 }
 0x52a   :  { %v1236_v26 = vpop.f32.mrb[4].mxu1 }
 0x52b   :  { %v777_v27 = vadd.f32 1e-05, %v1236_v26  ;;  %v767_v28 = vpop.f32.mrb[5].mxu1 }
 0x52c   :  { %v776_v29 = vsub.f32 %v1999_v52, %v767_v28 }
 0x52d   :  { %1497 = vrsqrt.f32 %v777_v27 }
 0x537   :  { %v1498_v30 = vpop.eup %1497 }
 0x538   :  { %v779_v32 = vmul.f32 %v1498_v30, %v776_v29 }
 0x53a   :  { %v786_v34 = vmul.f32 %v901_v31, %v779_v32 }
 0x53c   :  { %v793_v35 = vadd.f32 %v902_v33, %v786_v34 }
 0x53e   :  { %v794_v60 = vsub.f32 0.0, %v793_v35 }
 0x540   :  { %v795_v36 = vmul.f32 1.442695, %v794_v60 }
 0x542   :  { %1499 = vpow2.f32 %v795_v36 }
 0x54c   :  { %v1500_v37 = vpop.eup %1499 }
 0x54d   :  { %v797_v38 = vadd.f32 1.0, %v1500_v37 }
 0x54f   :  { %1501 = vrcp.f32 %v797_v38 }
 0x559   :  { %v1502_v40 = vpop.eup %1501 }
 0x55a   :  { %v800_v41 = vmul.f32 %v1502_v40, %v793_v35 }
 0x55c   :  { %1270 = vmatmul.mubr.f32.vlgmr.msra.gmra.mrb[6].mxu0 %v800_v41 }
 0x62f   :  { %v873_v43 = vpop.f32.mrb[6].mxu0 }
 0x630   :  { %v874_v44 = vadd.f32 %v903_v42, %v873_v43  ;;  %v1271_v45 = vpop.f32.mrb[7].mxu0 }
 0x632   :  { %v877_v46 = vadd.f32 %v874_v44, %v1959_v11 }
 0x634   :  { %878 = vst [vmem:[#allocation17] sm:$0xff] %v877_v46 }
 0x635   :  { %1712 = shalt.err (!%p1709_p6)
}
 0x636   :  { %s1713_s14 = scalar_lea.hbm %s2051_s15, 128 }
 0x637   :  { %p1714_p7 = scmp.ne.s32.totalorder %s2051_s15, %s1713_s14  ;;  %p1717_p8 = scmp.lt.u32.totalorder %s1713_s14, %s2051_s15 }
 0x639   :  { %p1719_p9 = pnand %p1717_p8, %p1714_p7 }
 0x63b   :  { %1722 = shalt.err (!%p1719_p9)
}
 0x63c   :  { %888 = dma.vmem_to_hbm [thread:$0]  %s886_s21, 128, %s2051_s15, [#allocation4]  }
 0x63d   :  { %1733 = dma.done.wait [#allocation4], 128  }
 0x63e   :  { %1734 = vsyncadd [#allocation4], 4294967168 }
 0x63f   :  { %892 = vsyncpa [#allocation3], 1 }
 0x640   :  { %893 = vsyncpa [#allocation6], 1 }
 0x641   :  { %894 = vsyncpa [#allocation9], 1 }
 0x642   :  { %895 = vsyncpa [#allocation12], 1 }
 0x643   :  { %896 = vsyncpa [#allocation15], 1 }
 0x644   :  { %897 = vsyncpa [#allocation4], 1 }

</bundles_post_ra>
